<compile_context>
chip_gen: v5e
topology: v5e:2x2
jax: 0.10.0
libtpu: 0.0.40
codegen_flags: <defaults>
</compile_context>

<pallas_src>
import functools

import jax
import jax.numpy as jnp
import numpy as np
from jax.experimental import pallas as pl
from jax.experimental.pallas import tpu as pltpu


# Conservative per-step VMEM budget: fits v5e's 16 MiB scoped default with
# headroom and is far below v7x's 64 MiB physical VMEM.
_VMEM_BUDGET_BYTES = 12 << 20

# Below this size the whole op is a few KB; XLA fusion beats kernel-launch +
# per-step overhead, so the auto path (use_pallas=None) stays on pure JAX.
_MIN_PALLAS_ELEMS = 1 << 16


def _divisors(n):
    return [d for d in range(1, n + 1) if n % d == 0]


def _select_tiling(sg, G, C, HW, nf, itemsize, budget=_VMEM_BUDGET_BYTES):
    """Pick (group_block, feature_tile, footprint) for the kernel, or None.

    Constraints:
      * payload lanes P = C*HW must be a multiple of 128 (lane-dense stores);
      * group_block is a multiple of the dtype's sublane packing and divides G,
        or is the full extent G;
      * feature_tile divides num_features and keeps the payload tile lane-dense.
    Preference (lexicographic):
      1. >= 2 steps on the "parallel" group axis (v7x megacore + pipelining),
      2. >= 2 total grid steps (DMA/compute overlap even when G is small),
      3. largest block that fits the VMEM budget (fewest per-step overheads).
    """
    Cg = C // nf
    Pf = Cg * HW
    P = C * HW
    out_row = P + nf * HW

    if P % 128 != 0:
        return None  # masked partial stores everywhere: leave on the XLA path

    pack = {4: 8, 2: 16, 1: 32}.get(itemsize, 8)
    gb_cands = [g for g in range(pack, G + 1, pack) if G % g == 0] or [G]
    ft_cands = [f for f in _divisors(nf) if (f * Pf) % 128 == 0 or f * Pf == P]

    def footprint(gb, ft):
        pb = ft * Pf
        in_blk = sg * gb * pb * itemsize          # double-buffered input tile
        out_blk = sg * gb * out_row * itemsize    # resident output row block
        temps = 4 * gb * pb * 4                   # f32 mean/var/std temporaries
        return 2 * in_blk + 2 * out_blk + temps

    valid = [(gb, ft) for ft in ft_cands for gb in gb_cands
             if footprint(gb, ft) <= budget]
    if not valid:
        return None

    def score(gb, ft):
        par_steps = G // gb
        total_steps = par_steps * (nf // ft)
        return (par_steps >= 2, total_steps >= 2, gb * ft * Pf)

    gb, ft = max(valid, key=lambda p: score(*p))
    return gb, ft, footprint(gb, ft)


def _make_mbstd_kernel(sg, Gb, ftile, Pf, HW, P, num_tiles):
    """Kernel for one (group-block, payload-tile) grid cell.

    x_ref:   (sg, Gb, Pb)          Pb = ftile*Pf lanes (ftile whole features)
    out_ref: (sg, Gb, P + nf*HW)   full output row, VMEM-resident across the
                                   payload axis (same block index every tile);
                                   every lane is written exactly once.
    """
    Pb = ftile * Pf
    tail_chunk = ftile * HW
    inv_sg = 1.0 / sg
    inv_pf = 1.0 / Pf

    def kernel(x_ref, out_ref):
        if num_tiles == 1:
            pay_off = 0
            tail_off = P
        else:
            t = pl.program_id(1)
            pay_off = pl.multiple_of(t * Pb, 128)       # Pb % 128 == 0 when T > 1
            tail_off = P + t * tail_chunk
            if tail_chunk % 128 == 0:
                tail_off = pl.multiple_of(tail_off, 128)

        # Pass 1 -- stream subgroup slices: passthrough store + mean accumulate.
        # Never materialises the whole (sg, Gb, Pb) block; the passthrough store
        # stays in the input dtype (bit-exact) and per-slice f32 temps keep
        # vreg/VMEM pressure low.
        acc = jnp.zeros((Gb, Pb), jnp.float32)
        for s in range(sg):                             # static, tiny loop
            xs = x_ref[s]                               # (Gb, Pb)
            out_ref[s, :, pl.ds(pay_off, Pb)] = xs
            acc = acc + xs.astype(jnp.float32)
        mu = acc * inv_sg

        # Pass 2 -- biased variance over the subgroup (matches torch: mean of
        # centred squares), then std with eps inside the sqrt.
        vacc = jnp.zeros((Gb, Pb), jnp.float32)
        for s in range(sg):
            d = x_ref[s].astype(jnp.float32) - mu
            vacc = vacc + d * d
        std = jnp.sqrt(vacc * inv_sg + 1e-8)            # (Gb, Pb)

        # One scalar per (group, feature): mean of std over that feature's Pf
        # lanes, broadcast over subgroup members and pixels.  All ftile feature
        # chunks are fused into a single tail store.
        parts = []
        for f in range(ftile):                          # static, tiny loop
            stat_f = jnp.sum(std[:, f * Pf:(f + 1) * Pf], axis=-1,
                             keepdims=True) * inv_pf    # (Gb, 1)
            parts.append(jnp.broadcast_to(stat_f, (Gb, HW)))
        tail2d = parts[0] if ftile == 1 else jnp.concatenate(parts, axis=-1)
        tail = jnp.broadcast_to(tail2d[None], (sg, Gb, tail_chunk))
        out_ref[:, :, pl.ds(tail_off, tail_chunk)] = tail.astype(out_ref.dtype)

    return kernel


def _mbstd_pallas(x, sg, num_features, Gb, ftile, footprint):
    B, C, H, W = x.shape
    G = B // sg
    HW = H * W
    Cg = C // num_features
    Pf = Cg * HW
    P = C * HW
    out_row = P + num_features * HW
    T = num_features // ftile
    Pb = ftile * Pf
    itemsize = x.dtype.itemsize

    # Free, contiguous reshape: batch index b = s*G + g (matches the PyTorch
    # .view(sg, -1, ...) split); each sample's (C, H, W) is flattened onto the
    # lane axis so both the passthrough and the stat stores are lane-dense.
    x_g = x.reshape(sg, G, P)

    kernel = _make_mbstd_kernel(sg, Gb, ftile, Pf, HW, P, T)

    vmem_limit = int(min(max(2 * footprint, 24 << 20), 64 << 20))
    cost = pl.CostEstimate(
        flops=6 * B * C * HW,                           # mean/var/std elementwise
        transcendentals=G * P,                          # one sqrt per (group, lane)
        bytes_accessed=(B * C * HW + B * (C + num_features) * HW) * itemsize,
    )

    out = pl.pallas_call(
        kernel,
        out_shape=jax.ShapeDtypeStruct((sg, G, out_row), x.dtype),
        grid=(G // Gb, T),
        in_specs=[pl.BlockSpec((sg, Gb, Pb), lambda g, t: (0, g, t))],
        # Output row block is revisited across the payload axis -> VMEM-resident;
        # the T payload steps together write every lane exactly once.
        out_specs=pl.BlockSpec((sg, Gb, out_row), lambda g, t: (0, g, 0)),
        compiler_params=pltpu.CompilerParams(
            dimension_semantics=("parallel", "arbitrary"),
            vmem_limit_bytes=vmem_limit),
        cost_estimate=cost,
    )(x_g)

    # Free reshape back to NCHW: row layout is [x[b] flat, stat_0*HW, stat_1*HW, ...].
    return out.reshape(B, C + num_features, H, W)


def minibatch_stddev_ref(x, *, subgroup_size, num_features):
    """Pure-JAX reference mirroring the PyTorch forward exactly."""
    B, C, H, W = x.shape
    sg = min(B, subgroup_size)
    if B % sg != 0:
        sg = B
    if sg > 1:
        y = x.reshape(sg, B // sg, num_features, C // num_features, H, W)
        y = y - jnp.mean(y, axis=0, keepdims=True)
        y = jnp.mean(y ** 2, axis=0, keepdims=True)
        y = jnp.sqrt(y + 1e-8)
        y = jnp.mean(y, axis=(3, 4, 5), keepdims=True)[:, :, :, 0]   # (1, G, nf, 1, 1)
        y = jnp.broadcast_to(y, (sg, B // sg, num_features, H, W))
        y = y.reshape(B, num_features, H, W)
    else:
        y = jnp.zeros((B, num_features, H, W), dtype=x.dtype)
    return jnp.concatenate([x, y], axis=1)


@functools.partial(jax.jit,
                   static_argnames=("subgroup_size", "num_features", "use_pallas"))
def minibatch_stddev(x, *, subgroup_size, num_features, use_pallas=None):
    """Pallas implementation of MiniBatchStdDev.forward. x: (B, C, H, W) NCHW."""
    B, C, H, W = x.shape
    if C % num_features != 0:
        raise ValueError(
            f"channels ({C}) must be divisible by num_features ({num_features})")

    sg = min(B, subgroup_size)
    if B % sg != 0:
        sg = B

    if sg <= 1:
        # Degenerate case (effective batch of 1): stat channels are all zeros.
        zeros = jnp.zeros((B, num_features, H, W), dtype=x.dtype)
        return jnp.concatenate([x, zeros], axis=1)

    tiling = _select_tiling(sg, B // sg, C, H * W, num_features,
                            x.dtype.itemsize)

    if use_pallas is None:
        use_pallas = (x.size >= _MIN_PALLAS_ELEMS) and (tiling is not None)
    if (not use_pallas) or tiling is None:
        # Non-lane-dense payloads (C*H*W % 128 != 0), oversized rows, or tiny
        # inputs stay on the XLA path (see TODO at top for the oversized case).
        return minibatch_stddev_ref(
            x, subgroup_size=subgroup_size, num_features=num_features)

    Gb, ftile, footprint = tiling
    return _mbstd_pallas(x, sg, num_features, Gb, ftile, footprint)


if __name__ == "__main__":
    # Module "parameters" (deterministic, from __init__ signature)
    SUBGROUP_SIZE = 2
    NUM_FEATURES = 2

    key = jax.random.PRNGKey(0)

    # Case 1: canonical small shape (G=1 -> full-extent group block, payload
    # axis tiled into T=2 whole-feature tiles).
    x = jax.random.normal(key, (2, 4, 16, 16), dtype=jnp.float32)  # NCHW
    out = minibatch_stddev(x, subgroup_size=SUBGROUP_SIZE,
                           num_features=NUM_FEATURES, use_pallas=True)
    out = jax.block_until_ready(out)
    ref = minibatch_stddev_ref(x, subgroup_size=SUBGROUP_SIZE,
                               num_features=NUM_FEATURES)
    assert out.shape == (2, 4 + NUM_FEATURES, 16, 16), out.shape
    np.testing.assert_allclose(np.asarray(out), np.asarray(ref),
                               rtol=1e-5, atol=1e-6)

    # Case 2: multi-step "parallel" group axis (B=32, sg=2 -> G=16 -> Gb=8 ->
    # grid=(2, 1)): exercises pipelining / megacore sharding.
    x2 = jax.random.normal(jax.random.PRNGKey(1), (32, 8, 8, 8), dtype=jnp.float32)
    out2 = minibatch_stddev(x2, subgroup_size=2, num_features=2, use_pallas=True)
    out2 = jax.block_until_ready(out2)
    ref2 = minibatch_stddev_ref(x2, subgroup_size=2, num_features=2)
    np.testing.assert_allclose(np.asarray(out2), np.asarray(ref2),
                               rtol=1e-5, atol=1e-6)

    # Case 3: sublane-dense group blocks + payload tiling together
    # (B=32, sg=4 -> G=8 -> Gb=8; nf=2 -> ftile=1 -> grid=(1, 2)).
    x3 = jax.random.normal(jax.random.PRNGKey(2), (32, 8, 16, 16), dtype=jnp.float32)
    out3 = minibatch_stddev(x3, subgroup_size=4, num_features=2, use_pallas=True)
    out3 = jax.block_until_ready(out3)
    ref3 = minibatch_stddev_ref(x3, subgroup_size=4, num_features=2)
    np.testing.assert_allclose(np.asarray(out3), np.asarray(ref3),
                               rtol=1e-5, atol=1e-6)

    print("KERNEL_OK")
</pallas_src>

<mosaic_0001>
module attributes {stable_mosaic.version = 11 : i64} {
  func.func @kernel(%arg0: i32, %arg1: i32, %arg2: memref<2x1x512xf32, #tpu.memory_space<vmem>>, %arg3: memref<2x1x1536xf32, #tpu.memory_space<vmem>>) attributes {dimension_semantics = [#tpu.dimension_semantics<parallel>, #tpu.dimension_semantics<arbitrary>], iteration_bounds = array<i64: 1, 2>, scalar_prefetch = 0 : i64, scratch_operands = 0 : i64, tpu.core_type = #tpu.core_type<tc>, window_params = [{transform_indices = @transform_0, window_bounds = array<i64: 2, 1, 512>}, {transform_indices = @transform_1, window_bounds = array<i64: 2, 1, 1536>}]} {
    %c512_i32 = arith.constant 512 : i32
    %0 = arith.muli %arg1, %c512_i32 : i32
    %1 = tpu.assume_multiple %0, 128 : i32
    %c256_i32 = arith.constant 256 : i32
    %2 = arith.muli %arg1, %c256_i32 : i32
    %c1024_i32 = arith.constant 1024 : i32
    %3 = arith.addi %c1024_i32, %2 : i32
    %4 = tpu.assume_multiple %3, 128 : i32
    %cst = arith.constant 0.000000e+00 : f32
    %5 = vector.broadcast %cst : f32 to vector<1x512xf32>
    %c0 = arith.constant 0 : index
    %c0_0 = arith.constant 0 : index
    %c0_1 = arith.constant 0 : index
    %6 = vector.load %arg2[%c0, %c0_0, %c0_1] : memref<2x1x512xf32, #tpu.memory_space<vmem>>, vector<1x1x512xf32>
    %7 = vector.shape_cast %6 : vector<1x1x512xf32> to vector<1x512xf32>
    %c0_2 = arith.constant 0 : index
    %c0_3 = arith.constant 0 : index
    %8 = arith.index_cast %1 : i32 to index
    %9 = vector.load %arg3[%c0_2, %c0_3, %8] : memref<2x1x1536xf32, #tpu.memory_space<vmem>>, vector<1x1x512xf32>
    %10 = vector.shape_cast %9 : vector<1x1x512xf32> to vector<1x512xf32>
    %11 = vector.shape_cast %7 : vector<1x512xf32> to vector<1x1x512xf32>
    tpu.vector_store %arg3[%c0_2, %c0_3, %8], %11 {strides = array<i32>} : memref<2x1x1536xf32, #tpu.memory_space<vmem>>, vector<1x1x512xf32>,
    %12 = arith.addf %5, %7 : vector<1x512xf32>
    %c1 = arith.constant 1 : index
    %c0_4 = arith.constant 0 : index
    %c0_5 = arith.constant 0 : index
    %13 = vector.load %arg2[%c1, %c0_4, %c0_5] : memref<2x1x512xf32, #tpu.memory_space<vmem>>, vector<1x1x512xf32>
    %14 = vector.shape_cast %13 : vector<1x1x512xf32> to vector<1x512xf32>
    %c1_6 = arith.constant 1 : index
    %c0_7 = arith.constant 0 : index
    %15 = arith.index_cast %1 : i32 to index
    %16 = vector.load %arg3[%c1_6, %c0_7, %15] : memref<2x1x1536xf32, #tpu.memory_space<vmem>>, vector<1x1x512xf32>
    %17 = vector.shape_cast %16 : vector<1x1x512xf32> to vector<1x512xf32>
    %18 = vector.shape_cast %14 : vector<1x512xf32> to vector<1x1x512xf32>
    tpu.vector_store %arg3[%c1_6, %c0_7, %15], %18 {strides = array<i32>} : memref<2x1x1536xf32, #tpu.memory_space<vmem>>, vector<1x1x512xf32>,
    %19 = arith.addf %12, %14 : vector<1x512xf32>
    %cst_8 = arith.constant 5.000000e-01 : f32
    %20 = vector.broadcast %cst_8 : f32 to vector<1x512xf32>
    %21 = arith.mulf %19, %20 : vector<1x512xf32>
    %cst_9 = arith.constant 0.000000e+00 : f32
    %22 = vector.broadcast %cst_9 : f32 to vector<1x512xf32>
    %c0_10 = arith.constant 0 : index
    %c0_11 = arith.constant 0 : index
    %c0_12 = arith.constant 0 : index
    %23 = vector.load %arg2[%c0_10, %c0_11, %c0_12] : memref<2x1x512xf32, #tpu.memory_space<vmem>>, vector<1x1x512xf32>
    %24 = vector.shape_cast %23 : vector<1x1x512xf32> to vector<1x512xf32>
    %25 = arith.subf %24, %21 : vector<1x512xf32>
    %26 = arith.mulf %25, %25 : vector<1x512xf32>
    %27 = arith.addf %22, %26 : vector<1x512xf32>
    %c1_13 = arith.constant 1 : index
    %c0_14 = arith.constant 0 : index
    %c0_15 = arith.constant 0 : index
    %28 = vector.load %arg2[%c1_13, %c0_14, %c0_15] : memref<2x1x512xf32, #tpu.memory_space<vmem>>, vector<1x1x512xf32>
    %29 = vector.shape_cast %28 : vector<1x1x512xf32> to vector<1x512xf32>
    %30 = arith.subf %29, %21 : vector<1x512xf32>
    %31 = arith.mulf %30, %30 : vector<1x512xf32>
    %32 = arith.addf %27, %31 : vector<1x512xf32>
    %cst_16 = arith.constant 5.000000e-01 : f32
    %33 = vector.broadcast %cst_16 : f32 to vector<1x512xf32>
    %34 = arith.mulf %32, %33 : vector<1x512xf32>
    %cst_17 = arith.constant 9.99999993E-9 : f32
    %35 = vector.broadcast %cst_17 : f32 to vector<1x512xf32>
    %36 = arith.addf %34, %35 : vector<1x512xf32>
    %37 = math.sqrt %36 : vector<1x512xf32>
    %cst_18 = arith.constant dense<0.000000e+00> : vector<1xf32>
    %38 = vector.multi_reduction <add>, %37, %cst_18 [1] : vector<1x512xf32> to vector<1xf32>
    %39 = vector.shape_cast %38 : vector<1xf32> to vector<1x1xf32>
    %cst_19 = arith.constant 0.001953125 : f32
    %40 = vector.broadcast %cst_19 : f32 to vector<1x1xf32>
    %41 = arith.mulf %39, %40 : vector<1x1xf32>
    %42 = vector.shape_cast %41 : vector<1x1xf32> to vector<1x1xf32>
    %43 = vector.broadcast %42 : vector<1x1xf32> to vector<1x256xf32>
    %44 = vector.shape_cast %43 : vector<1x256xf32> to vector<1x1x256xf32>
    %45 = vector.shape_cast %44 : vector<1x1x256xf32> to vector<1x1x256xf32>
    %46 = vector.broadcast %45 : vector<1x1x256xf32> to vector<2x1x256xf32>
    %c0_20 = arith.constant 0 : index
    %c0_21 = arith.constant 0 : index
    %47 = arith.index_cast %4 : i32 to index
    %48 = vector.load %arg3[%c0_20, %c0_21, %47] : memref<2x1x1536xf32, #tpu.memory_space<vmem>>, vector<2x1x256xf32>
    tpu.vector_store %arg3[%c0_20, %c0_21, %47], %46 {strides = array<i32>} : memref<2x1x1536xf32, #tpu.memory_space<vmem>>, vector<2x1x256xf32>,
    return
  }
  func.func @transform_0(%arg0: i32, %arg1: i32) -> (i32, i32, i32) {
    %c0_i32 = arith.constant 0 : i32
    %c0_i32_0 = arith.constant 0 : i32
    return %c0_i32, %arg0, %arg1 : i32, i32, i32
  }
  func.func @transform_1(%arg0: i32, %arg1: i32) -> (i32, i32, i32) {
    %c0_i32 = arith.constant 0 : i32
    %c0_i32_0 = arith.constant 0 : i32
    %c0_i32_1 = arith.constant 0 : i32
    return %c0_i32, %arg0, %c0_i32_0 : i32, i32, i32
  }
}

</mosaic_0001>

<bundles_post_ra>
// kernel: minibatch_stddev.1
= control target key start
LH: loop header
LB: loop body
LE: loop exit
PB: predicated region body
PF: predicated region fallthrough
CT: control target
= control target key end

     0   :  { %s429_s6 = smov 0   ;;  %s431_s7 = smov 0   ;;  %s498_s0 = inlined_call_operand.vmem [shape: f32[2,1,1024], index: 0, kind: input, shape index: {}]   ;;  %s499_s1 = inlined_call_operand.vmem [shape: f32[2,1,1536], index: 1, kind: output, shape index: {}]  }
   0x1   :  { %s433_s8 = smov 0   ;;  %s435_s9 = smov 0  }
   0x2   :  { %s437_s10 = smov 0  }
   0x3 LB: > { %s20_s11 = sadd.s32 1, %s413_s9  ;;  %p39_p1 = scmp.ne.s32.totalorder %s405_s7, %s401_s6  ;;  %s417_s10 = sphi %s437_s10, %s11_s10   ;;  %s413_s9 = sphi %s435_s9, %s503_s9   ;;  %s409_s8 = sphi %s433_s8, %s502_s8   ;;  %s405_s7 = sphi %s431_s7, %s501_s7   ;;  %s401_s6 = sphi %s429_s6, %s500_s6  }
   0x4   : > { %p21_p0 = scmp.ge.s32.totalorder %s20_s11, 2  ;;  %p40_p2 = scmp.eq.s32.totalorder %s417_s10, 0 }
   0x5   : > { %s32_s13 = sadd.s32 1, %s405_s7  ;;  %p324_p5 = scmp.ge.s32.totalorder %s417_s10, 2 }
   0x6   : > { %s505_s11 = smov (%p21_p0, %s20_s11), 0  ;;  %p41_p3 = por %p40_p2, %p39_p1 }
   0x7   : > { %s28_s12 = ssub.s32 %s413_s9, %s505_s11  ;;  %91 = sbr.rel (%p324_p5) target bundleno = 18 (0x12), region = 16 }
   0x8   : > { %p30_p4 = scmp.eq.s32.totalorder %s28_s12, 0 }
   0xa   : > { %s464_s14 = scalar_select %p30_p4, %s405_s7, %s32_s13  }
   0xc   : > { %94 = sbr.rel (!%p41_p3) target bundleno = 18 (0x12), region = 20  ;;  %s96_s15 = sand.u32 (%p41_p3), 1, %s405_s7  }
   0xd   : > { %s326_s16 = sshll.u32 (%p41_p3), %s413_s9, 2  ;;  %s325_s17 = sshll.u32 (%p41_p3), %s96_s15, 3 }
   0xe   : > { %s102_s20 = scalar_lea.vmem (%p41_p3), %s498_s0, %s326_s16  ;;  %s98_s21 = scalar_lea.vmem (%p41_p3), [#allocation2], %s325_s17 }
   0xf   : > { %v119_v0 = vld [vmem:[%s102_s20] sm:$0xf] (%p41_p3)  ;;  %v121_v1 = vld [vmem:[%s102_s20 + $0x8] sm:$0xf] (%p41_p3) }
  0x10   : > { %120 = vst [vmem:[%s98_s21] sm:$0xf] (%p41_p3), %v119_v0 }
  0x11   : > { %122 = vst [vmem:[%s98_s21 + $0x4] sm:$0xf] %v121_v1 }
  0x12 PF: > { %p327_p6 = scmp.ge.s32.totalorder %s417_s10, 1  ;;  %p149_p7 = scmp.lt.s32.totalorder %s417_s10, 3 }
  0x14   : > { %p150_p8 = pnand %p327_p6, %p149_p7 }
  0x15   : > { %s156_s22 = sand.u32 (!%p150_p8), 1, %s401_s6   ;;  %s329_s25 = sshll.u32 (!%p150_p8), %s409_s8, 9 }
  0x16   : > { %153 = sbr.rel (%p150_p8) target bundleno = 194 (0xc2), region = 61  ;;  %s328_s23 = sshll.u32 (!%p150_p8), %s156_s22, 3 }
  0x17   : > { %s158_s24 = scalar_lea.vmem (!%p150_p8), [#allocation2], %s328_s23  ;;  %s183_s26 = sshra.s32 (!%p150_p8), %s329_s25, 7 }
  0x18   : > { %s185_s29 = scalar_lea.vmem (!%p150_p8), %s499_s1, %s183_s26  ;;  %s330_s30 = sshll.u32 (!%p150_p8), %s409_s8, 8 }
  0x19   : > { %s181_s2 = sadd.s32 (!%p150_p8), 1024, %s330_s30 }
  0x1a   : > { %s244_s3 = sshra.s32 (!%p150_p8), %s181_s2, 7 }
  0x1b   : > { %v182_v2 = vld [vmem:[%s158_s24] sm:$0xf]  ;;  %v331_v3 = vld [vmem:[%s158_s24 + $0x4] sm:$0xf]  ;;  %v186_v15 = vlaneseq  ;;  %vm230_vm3 = vcmask 1040384   ;;  %s246_s6 = scalar_lea.vmem %s499_s1, %s244_s3 }
  0x1c   : > { %v197_v4 = vadd.f32 %v331_v3, %v182_v2  ;;  %v199_v5 = vld [vmem:[%s158_s24] sm:$0xf]  ;;  %v333_v6 = vld [vmem:[%s158_s24 + $0x4] sm:$0xf] }
  0x1d   : > { %vm188_vm0 = vcmp.lt.s32.totalorder %v186_v15, 512  ;;  %vm247_vm4 = vcmp.lt.s32.totalorder %v186_v15, 256 }
  0x1e   : > { %v198_v7 = vmul.f32 0.5, %v197_v4  ;;  %190 = vst.msk [vmem:[%s185_s29] sm:$0xf] %vm188_vm0, %v182_v2 }
  0x1f   : > { %332 = vst.msk [vmem:[%s185_s29 + $0xc] sm:$0xf] %vm188_vm0, %v331_v3 }
  0x20   : > { %v200_v8 = vsub.f32 %v199_v5, %v198_v7  ;;  %v204_v9 = vsub.f32 %v333_v6, %v198_v7 }
  0x22   : > { %v201_v10 = vmul.f32 %v200_v8, %v200_v8  ;;  %v205_v11 = vmul.f32 %v204_v9, %v204_v9 }
  0x24   : > { %v206_v12 = vadd.f32 %v205_v11, %v201_v10 }
  0x26   : > { %v207_v13 = vmul.f32 0.5, %v206_v12 }
  0x28   : > { %v208_v14 = vadd.f32 1e-08, %v207_v13 }
  0x2a   : > { %377 = vrsqrt.f32 %v208_v14  ;;  %vm216_vm1 = vcmp.eq.f32.partialorder %v208_v14, inf  ;;  %v219_v22 = vand.u32 2147483648, %v208_v14  ;;  %vm218_vm2 = vcmp.eq.f32.partialorder %v208_v14, 0.0 }
  0x30   : > { %v378_v16 = vpop.eup %377 }
  0x31   : > { %v210_v17 = vmul.f32 %v378_v16, %v208_v14 }
  0x33   : > { %v211_v18 = vmul.f32 %v378_v16, %v210_v17 }
  0x35   : > { %v212_v19 = vmul.f32 0.5, %v211_v18 }
  0x37   : > { %v213_v20 = vsub.f32 1.5, %v212_v19 }
  0x39   : > { %v214_v21 = vmul.f32 %v378_v16, %v213_v20 }
  0x3b   : > { %v215_v23 = vmul.f32 %v214_v21, %v208_v14 }
  0x3d   : > { %v217_v24 = vsel %vm216_vm1, %v208_v14, %v215_v23 }
  0x3e   : > { %v220_v25 = vsel %vm218_vm2, %v219_v22, %v217_v24 }
  0x3f   : > { %v222_v26 = vperm.slane %v220_v25, 0  ;;  %v223_v27 = vperm.slane %v220_v25, 1  ;;  %v224_v28 = vperm.slane %v220_v25, 2  ;;  %v225_v29 = vperm.slane %v220_v25, 3 }
  0x41   : > { %v231_v30 = vsel %vm230_vm3, %v222_v26, 0.0  ;;  %v232_v31 = vsel %vm230_vm3, %v223_v27, 0.0  ;;  %v234_v32 = vsel %vm230_vm3, %v224_v28, 0.0  ;;  %v236_v34 = vsel %vm230_vm3, %v225_v29, 0.0 }
  0x42   : > { %v233_v33 = vadd.f32 %v232_v31, %v231_v30 }
  0x44   : > { %v235_v35 = vadd.f32 %v234_v32, %v233_v33 }
  0x46   : > { %v237_v36 = vadd.f32 %v236_v34, %v235_v35 }
  0x48   : > { %238 = vadd.xlane.f32.xlu0 %v237_v36 }
  0xbb   : > { %v239_v37 = vpop.xlane.xlu0 %238 }
  0xbc   : > { %v240_v38 = vmul.f32 0.001953125, %v239_v37 }
  0xbe   : > { %v242_v39 = vperm.slane %v240_v38, 0 }
  0xc0   : > { %249 = vst.msk [vmem:[%s246_s6] sm:$0x3] %vm247_vm4, %v242_v39 }
  0xc1   : > { %250 = vst.msk [vmem:[%s246_s6 + $0xc] sm:$0x3] %vm247_vm4, %v242_v39 }
  0xc2 PF: > { %s11_s10 = sadd.s32 1, %s417_s10   ;;  %s500_s6 = smov %s405_s7 }
  0xc3   : > { %p8_p9 = scmp.ge.s32.totalorder %s11_s10, 4   ;;  %s501_s7 = smov %s464_s14 }
  0xc4   : > { %s502_s8 = smov %s413_s9  ;;  %s503_s9 = smov %s505_s11 }
  0xc5   :  { %10 = sbr.rel (!%p8_p9) target bundleno = 3 (0x3), region = 104 }

</bundles_post_ra>
